<compile_context>
chip_gen: v6e
topology: v6e:2x2x1
jax: 0.10.0
libtpu: 0.0.40
codegen_flags: <defaults>
</compile_context>

<pallas_src>
import functools

import jax
import jax.numpy as jnp
from jax.experimental import pallas as pl
from jax.experimental.pallas import tpu as pltpu


# --------------------------- AvgReadout kernel -------------------------------
# Direct Pallas equivalent of the spec module: out = mean(seq, axis=1).
# Single statement, whole batch in one step (per-step overhead >> compute here).
# TODO(synk): for large seq, tile over B with a BlockSpec grid + "parallel"
# dimension_semantics instead of whole-array VMEM residency.
def _avg_readout_kernel(x_ref, o_ref):
    o_ref[...] = jnp.mean(
        x_ref[...].astype(jnp.float32), axis=1
    ).astype(o_ref.dtype)


def avg_readout(seq):
    B, N, F = seq.shape
    return pl.pallas_call(
        _avg_readout_kernel,
        out_shape=jax.ShapeDtypeStruct((B, F), seq.dtype),
        in_specs=[pl.BlockSpec(memory_space=pltpu.MemorySpace.VMEM)],
        out_specs=pl.BlockSpec(memory_space=pltpu.MemorySpace.VMEM),
    )(seq)


# ---------------------- Fully fused ANEMONE forward kernel -------------------
def _anemone_kernel(seq_ref, blkadj_ref, sel_ref, w_ref, b_ref, alpha_ref,
                    wcd_ref, wpd_ref, perm_ref, db_ref,
                    out1_ref, out2_ref, *, B, r1, r2):
    f32 = jnp.float32

    # ---- fused GCN (context || patch): two lane-dense matmuls ---------------
    # (B*N, Fin) @ (Fin, Hpad): feeds BOTH GCNs at once (w_c || w_p, zero-padded
    # to a 128-lane output).  Operands may be bf16; accumulation is f32.
    fts = jnp.dot(seq_ref[...], w_ref[...], preferred_element_type=f32)
    # Block-diagonal adjacency: ONE (B*N, B*N) @ (B*N, Hpad) matmul replaces the
    # per-subgraph loop of sub-tile matmuls.  adj stays f32 (accuracy).
    h = jnp.dot(blkadj_ref[...], fts, preferred_element_type=f32)
    h = h + b_ref[...]
    h = jnp.where(h > 0, h, alpha_ref[...] * h)            # PReLU (f32, VPU)

    # ---- AvgReadout + row extraction as ONE selection matmul (no scratch) ---
    # sel rows per subgraph: [mean over nodes 0..N-2], [one-hot node -1],
    # [one-hot node -2]  ->  rows is (3B, Hpad), consumed straight from vregs.
    rows = jnp.dot(sel_ref[...], h, preferred_element_type=f32)
    row_red = rows[0:B]            # readout(h_1[:, :-1]) || readout(h_2[:, :-1])
    row_last = rows[B:2 * B]       # h_1[:, -1, :]        || h_2[:, -1, :]
    row_pen = rows[2 * B:3 * B]    # h_1[:, -2, :]        || h_2[:, -2, :]

    perm = perm_ref[...]           # host-built negative-sample permutation (B,B)

    # ---- bilinear discriminators, fully lane-dense ---------------------------
    # Disc weights are zero-padded (Hpad, Hpad) with the real (n_h, n_h) block on
    # the context (resp. patch) diagonal: padded rows/cols contribute exact
    # zeros, so the full padded rows can be used with no lane slicing.
    def disc(h_first, second0, w_disc_ref, bias_s, out_ref, rounds):
        hw = jnp.dot(h_first, w_disc_ref[...], preferred_element_type=f32)
        cur = second0
        for r in range(rounds + 1):                    # static, tiny trip count
            if r > 0:
                cur = jnp.dot(perm, cur, preferred_element_type=f32)
            # Output is (R, B, 1): only R*B scalars total, lane density immaterial.
            out_ref[r] = jnp.sum(hw * cur, axis=-1, keepdims=True) + bias_s

    disc(row_last, row_red, wcd_ref, db_ref[0], out1_ref, r1)   # context disc
    disc(row_last, row_pen, wpd_ref, db_ref[1], out2_ref, r2)   # patch disc


def anemone_forward(params, seq1, adj, *, readout="avg",
                    negsamp_round_patch=1, negsamp_round_context=1,
                    use_bf16=False):
    B, N, Fin = seq1.shape
    n_h = params["w_c"].shape[1]
    r1 = negsamp_round_context
    r2 = negsamp_round_patch
    f32 = jnp.float32

    if readout != "avg":
        # TODO(synk): 'max'/'min'/'weighted_sum' readouts not implemented in the
        # fused kernel (the spec module is AvgReadout).
        raise NotImplementedError("only 'avg' readout is implemented")
    if B < 2:
        raise ValueError("negative-sample shift requires B >= 2")
    if B * N > 256:
        # TODO(synk): tile with a parallel batch grid axis for large B*N.
        raise NotImplementedError("single-step fused path requires B*N <= 256")

    # bf16 operands for the big seq@W matmul are fine on v5e/v6e/v7x (bf16-native
    # MXU, f32 accumulation); adjacency and all epilogue math stay in f32.
    cdt = jnp.bfloat16 if use_bf16 else f32
    Hpad = max(128, -(-2 * n_h // 128) * 128)      # lane-dense fused hidden dim

    # Fused GCN parameters: context || patch, zero-padded to Hpad lanes.
    w_cat = (jnp.zeros((Fin, Hpad), f32)
             .at[:, :n_h].set(params["w_c"])
             .at[:, n_h:2 * n_h].set(params["w_p"])).astype(cdt)
    b_cat = (jnp.zeros((1, Hpad), f32)
             .at[:, :n_h].set(params["b_c"])
             .at[:, n_h:2 * n_h].set(params["b_p"]))
    alpha_cat = (jnp.zeros((1, Hpad), f32)
                 .at[:, :n_h].set(params["alpha_c"][0])
                 .at[:, n_h:2 * n_h].set(params["alpha_p"][0]))

    # Zero-padded discriminator weights on the context / patch diagonal blocks.
    w_cd_pad = jnp.zeros((Hpad, Hpad), f32).at[:n_h, :n_h].set(params["w_cd"])
    w_pd_pad = (jnp.zeros((Hpad, Hpad), f32)
                .at[n_h:2 * n_h, n_h:2 * n_h].set(params["w_pd"]))
    d_bias = jnp.concatenate([params["b_cd"], params["b_pd"]]).astype(f32)   # (2,)

    seq2d = seq1.reshape(B * N, Fin).astype(cdt)

    # Block-diagonal adjacency (kept f32: the dominant numeric-error source if
    # it were cast to bf16).
    eyeB = jnp.eye(B, dtype=f32)
    blkadj = jnp.einsum("bij,bc->bicj", adj.astype(f32), eyeB).reshape(B * N, B * N)

    # Selection matrix: averaging row over nodes 0..N-2, one-hot node -1,
    # one-hot node -2, block-diagonally placed per subgraph -> (3B, B*N).
    node = jnp.arange(N)
    avg_row = jnp.where(node < N - 1, 1.0 / (N - 1), 0.0).astype(f32)
    last_row = (node == N - 1).astype(f32)
    pen_row = (node == N - 2).astype(f32)

    def _expand(r):                      # (N,) -> (B, B*N) block-diagonal rows
        return jnp.einsum("bc,n->bcn", eyeB, r).reshape(B, B * N)

    sel = jnp.concatenate(
        [_expand(avg_row), _expand(last_row), _expand(pen_row)], axis=0)

    # Negative-sample shift  x -> cat(x[-2:-1], x[:-1])  as a permutation matrix
    # (hoisted host-side constant).
    rr = jnp.arange(B)[:, None]
    cc = jnp.arange(B)[None, :]
    perm = jnp.where(rr == 0, cc == B - 2, cc == rr - 1).astype(f32)

    kernel = functools.partial(_anemone_kernel, B=B, r1=r1, r2=r2)

    out1, out2 = pl.pallas_call(
        kernel,
        out_shape=(jax.ShapeDtypeStruct((r1 + 1, B, 1), f32),
                   jax.ShapeDtypeStruct((r2 + 1, B, 1), f32)),
        in_specs=[
            pl.BlockSpec(memory_space=pltpu.MemorySpace.VMEM),   # seq2d  (B*N, Fin)
            pl.BlockSpec(memory_space=pltpu.MemorySpace.VMEM),   # blkadj (B*N, B*N)
            pl.BlockSpec(memory_space=pltpu.MemorySpace.VMEM),   # sel    (3B, B*N)
            pl.BlockSpec(memory_space=pltpu.MemorySpace.VMEM),   # w_cat  (Fin, Hpad)
            pl.BlockSpec(memory_space=pltpu.MemorySpace.VMEM),   # b_cat  (1, Hpad)
            pl.BlockSpec(memory_space=pltpu.MemorySpace.VMEM),   # alpha  (1, Hpad)
            pl.BlockSpec(memory_space=pltpu.MemorySpace.VMEM),   # w_cd_pad
            pl.BlockSpec(memory_space=pltpu.MemorySpace.VMEM),   # w_pd_pad
            pl.BlockSpec(memory_space=pltpu.MemorySpace.VMEM),   # perm (B, B)
            pl.BlockSpec(memory_space=pltpu.MemorySpace.SMEM),   # (b_cd, b_pd)
        ],
        out_specs=(pl.BlockSpec(memory_space=pltpu.MemorySpace.VMEM),
                   pl.BlockSpec(memory_space=pltpu.MemorySpace.VMEM)),
    )(seq2d, blkadj, sel, w_cat, b_cat, alpha_cat, w_cd_pad, w_pd_pad, perm, d_bias)

    # (R, B, 1) -> (R*B, 1): same row order as torch.cat(tuple(scs), 0)
    return out1.reshape((r1 + 1) * B, 1), out2.reshape((r2 + 1) * B, 1)


# ------------------------------ reference (pure JAX) --------------------------
def _neg_shift(x):
    # torch.cat((x[-2:-1, :], x[:-1, :]), 0)
    return jnp.concatenate([x[-2:-1, :], x[:-1, :]], axis=0)


def _ref_forward(params, seq1, adj, negsamp_round_patch=1, negsamp_round_context=1):
    def gcn(seq, a, w, b, alpha):
        fts = jnp.einsum("bnf,fh->bnh", seq, w)
        out = jnp.einsum("bij,bjh->bih", a, fts) + b[0]
        return jnp.where(out > 0, out, alpha[0] * out)

    def disc(h, s0, rounds, w, bias):
        scs = [jnp.sum((h @ w) * s0, -1, keepdims=True) + bias[0]]
        cur = s0
        for _ in range(rounds):
            cur = _neg_shift(cur)
            scs.append(jnp.sum((h @ w) * cur, -1, keepdims=True) + bias[0])
        return jnp.concatenate(scs, axis=0)

    h_1 = gcn(seq1, adj, params["w_c"], params["b_c"], params["alpha_c"])
    h_2 = gcn(seq1, adj, params["w_p"], params["b_p"], params["alpha_p"])
    c = jnp.mean(h_1[:, :-1, :], axis=1)
    r1 = disc(h_1[:, -1, :], c, negsamp_round_context, params["w_cd"], params["b_cd"])
    r2 = disc(h_2[:, -1, :], h_2[:, -2, :], negsamp_round_patch, params["w_pd"], params["b_pd"])
    return r1, r2


# ------------------------------ param init ------------------------------------
def _xavier(key, shape):
    fan_in, fan_out = shape[0], shape[1]
    bound = (6.0 / (fan_in + fan_out)) ** 0.5
    return jax.random.uniform(key, shape, jnp.float32, -bound, bound)


def init_params(key, n_in, n_h):
    ks = jax.random.split(key, 4)
    return {
        "w_c": _xavier(ks[0], (n_in, n_h)),
        "b_c": jnp.zeros((1, n_h), jnp.float32),
        "alpha_c": jnp.full((1,), 0.25, jnp.float32),
        "w_p": _xavier(ks[1], (n_in, n_h)),
        "b_p": jnp.zeros((1, n_h), jnp.float32),
        "alpha_p": jnp.full((1,), 0.25, jnp.float32),
        "w_cd": _xavier(ks[2], (n_h, n_h)),
        "b_cd": jnp.zeros((1,), jnp.float32),
        "w_pd": _xavier(ks[3], (n_h, n_h)),
        "b_pd": jnp.zeros((1,), jnp.float32),
    }


if __name__ == "__main__":
    B, N, n_in, n_h = 4, 8, 16, 32
    key = jax.random.PRNGKey(0)
    k_seq, k_adj, k_par = jax.random.split(key, 3)

    seq1 = jax.random.normal(k_seq, (B, N, n_in), jnp.float32)
    adj_raw = jax.random.uniform(k_adj, (B, N, N), jnp.float32)
    adj = adj_raw / jnp.sum(adj_raw, axis=-1, keepdims=True)   # row-normalized dense adjacency

    params = init_params(k_par, n_in, n_h)

    # 1) standalone AvgReadout kernel (the module spec): mean over dim 1
    c_pl = jax.block_until_ready(jax.jit(avg_readout)(seq1))
    assert c_pl.shape == (B, n_in)
    assert jnp.allclose(c_pl, jnp.mean(seq1, axis=1), atol=1e-5, rtol=1e-5)

    # 2) fully fused ANEMONE forward (AvgReadout fused via the selection matmul), f32
    fwd = jax.jit(functools.partial(anemone_forward, readout="avg",
                                    negsamp_round_patch=1, negsamp_round_context=1,
                                    use_bf16=False))
    ret1, ret2 = jax.block_until_ready(fwd(params, seq1, adj))
    r1_ref, r2_ref = _ref_forward(params, seq1, adj)
    assert ret1.shape == (2 * B, 1) and ret2.shape == (2 * B, 1)
    assert jnp.allclose(ret1, r1_ref, atol=1e-4, rtol=1e-4)
    assert jnp.allclose(ret2, r2_ref, atol=1e-4, rtol=1e-4)

    # 3) bf16 MXU-operand path (all generations, incl. v5e), f32 accumulation
    fwd_bf16 = jax.jit(functools.partial(anemone_forward, readout="avg",
                                         negsamp_round_patch=1, negsamp_round_context=1,
                                         use_bf16=True))
    b1, b2 = jax.block_until_ready(fwd_bf16(params, seq1, adj))
    assert jnp.allclose(b1, r1_ref, atol=5e-2, rtol=5e-2)
    assert jnp.allclose(b2, r2_ref, atol=5e-2, rtol=5e-2)

    print("KERNEL_OK")
</pallas_src>

<mosaic_0001>
module attributes {stable_mosaic.version = 11 : i64} {
  func.func @_avg_readout_kernel(%arg0: memref<4x8x16xf32, #tpu.memory_space<vmem>>, %arg1: memref<4x16xf32, #tpu.memory_space<vmem>>) attributes {dimension_semantics = [], scalar_prefetch = 0 : i64, scratch_operands = 0 : i64, tpu.core_type = #tpu.core_type<tc>} {
    %c0 = arith.constant 0 : index
    %c0_0 = arith.constant 0 : index
    %c0_1 = arith.constant 0 : index
    %0 = vector.load %arg0[%c0, %c0_0, %c0_1] : memref<4x8x16xf32, #tpu.memory_space<vmem>>, vector<4x8x16xf32>
    %cst = arith.constant dense<0.000000e+00> : vector<4x16xf32>
    %1 = vector.multi_reduction <add>, %0, %cst [1] : vector<4x8x16xf32> to vector<4x16xf32>
    %cst_2 = arith.constant 8.000000e+00 : f32
    %2 = vector.broadcast %cst_2 : f32 to vector<4x16xf32>
    %3 = arith.divf %1, %2 : vector<4x16xf32>
    %c0_3 = arith.constant 0 : index
    %c0_4 = arith.constant 0 : index
    %4 = vector.load %arg1[%c0_3, %c0_4] : memref<4x16xf32, #tpu.memory_space<vmem>>, vector<4x16xf32>
    tpu.vector_store %arg1[%c0_3, %c0_4], %3 {strides = array<i32>} : memref<4x16xf32, #tpu.memory_space<vmem>>, vector<4x16xf32>,
    return
  }
}

</mosaic_0001>

<bundles_post_ra>
// kernel: avg_readout.1
= control target key start
LH: loop header
LB: loop body
LE: loop exit
PB: predicated region body
PF: predicated region fallthrough
CT: control target
= control target key end

     0   :  { %6 = vsyncpa [#allocation3], 0  ;;  %s157_s0 = inlined_call_operand.hbm [shape: f32[4,8,16], index: 0, kind: input, shape index: {}]   ;;  %s158_s1 = inlined_call_operand.hbm [shape: f32[4,16], index: 1, kind: output, shape index: {}]  }
   0x1   :  { %7 = vsyncpa [#allocation4], 0  ;;  %s137_s6 = smov [#allocation2]  }
   0x2   :  { %s13_s7 = sshll.u32 %s137_s6, 4  ;;  %s14_s7 = int_to_ptr.vmem [resolvable:$true] %s13_s7 }
   0x3   :  { %s101_s8 = scalar_lea.vmem %s14_s7, 512  ;;  %p106_p1 = scmp.lt.s32.totalorder %s14_s7, %s14_s7 }
   0x4   :  { %p102_p0 = scmp.ne.s32.totalorder %s14_s7, %s101_s8  ;;  %p107_p2 = scmp.lt.s32.totalorder %s101_s8, %s101_s8 }
   0x6   :  { %p108_p3 = por %p107_p2, %p106_p1 }
   0x8   :  { %p109_p4 = pnand %p108_p3, %p102_p0 }
   0xa   :  { %112 = shalt.err (!%p109_p4)
}
   0xb   :  { %s138_s9 = smov 128   ;;  %s139_s10 = smov 8  }
   0xc   :  { %19 = dma.hbm_to_vmem [thread:$0]  %s157_s0, 512, %s14_s7, [#allocation3], %s138_s9, %s138_s9, %s139_s10  }
   0xd   :  { %133 = dma.done.wait [#allocation3], 512  }
   0xe   :  { %134 = vsyncadd [#allocation3], 4294966784  ;;  %vm27_vm0 = vcmask 130048   ;;  %v23_v0 = vld [vmem:[#allocation2] sm:$0xff]  ;;  %v24_v1 = vld [vmem:[#allocation2 + $0x8] sm:$0xff]  ;;  %vm65_vm1 = vcmask 1041409  }
   0xf   :  { %v25_v2 = vld [vmem:[#allocation2 + $0x10] sm:$0xff]  ;;  %v26_v3 = vld [vmem:[#allocation2 + $0x18] sm:$0xff]  ;;  %v28_v4 = vsel %vm27_vm0, %v23_v0, 0.0  ;;  %v35_v5 = vsel %vm27_vm0, %v24_v1, 0.0  ;;  %vm67_vm2 = vcmask 1042434   ;;  %s140_s0 = smov [#allocation5]  }
  0x10   :  { %v42_v6 = vsel %vm27_vm0, %v25_v2, 0.0  ;;  %v29_v7 = vrot.slane %v28_v4, 4  ;;  %v36_v8 = vrot.slane %v35_v5, 4  ;;  %v49_v10 = vsel %vm27_vm0, %v26_v3, 0.0  ;;  %s80_s13 = sshll.u32 %s140_s0, 4  ;;  %s81_s13 = int_to_ptr.vmem [resolvable:$true] %s80_s13 }
  0x11   :  { %v43_v9 = vrot.slane %v42_v6, 4  ;;  %v50_v11 = vrot.slane %v49_v10, 4  ;;  %vm69_vm3 = vcmask 1043459   ;;  %vm72_vm4 = vcmask 125952   ;;  %s113_s14 = scalar_lea.vmem %s81_s13, 64  ;;  %p118_p6 = scmp.lt.s32.totalorder %s81_s13, %s81_s13 }
  0x12   :  { %v30_v12 = vadd.f32 %v29_v7, %v28_v4  ;;  %v37_v13 = vadd.f32 %v36_v8, %v35_v5  ;;  %p114_p5 = scmp.ne.s32.totalorder %s81_s13, %s113_s14  ;;  %p119_p7 = scmp.lt.s32.totalorder %s113_s14, %s113_s14 }
  0x13   :  { %v44_v14 = vadd.f32 %v43_v9, %v42_v6  ;;  %v51_v15 = vadd.f32 %v50_v11, %v49_v10 }
  0x14   :  { %v31_v16 = vrot.slane %v30_v12, 2  ;;  %v38_v17 = vrot.slane %v37_v13, 2  ;;  %p120_p8 = por %p119_p7, %p118_p6 }
  0x15   :  { %v45_v18 = vrot.slane %v44_v14, 2  ;;  %v52_v19 = vrot.slane %v51_v15, 2 }
  0x16   :  { %v32_v20 = vadd.f32 %v31_v16, %v30_v12  ;;  %v39_v21 = vadd.f32 %v38_v17, %v37_v13  ;;  %p121_p9 = pnand %p120_p8, %p114_p5 }
  0x17   :  { %v46_v22 = vadd.f32 %v45_v18, %v44_v14  ;;  %v53_v23 = vadd.f32 %v52_v19, %v51_v15 }
  0x18   :  { %v33_v24 = vrot.slane %v32_v20, 1  ;;  %v40_v25 = vrot.slane %v39_v21, 1 }
  0x19   :  { %v47_v26 = vrot.slane %v46_v22, 1  ;;  %v54_v27 = vrot.slane %v53_v23, 1 }
  0x1a   :  { %v34_v28 = vadd.f32 %v33_v24, %v32_v20  ;;  %v41_v29 = vadd.f32 %v40_v25, %v39_v21 }
  0x1b   :  { %v48_v30 = vadd.f32 %v47_v26, %v46_v22  ;;  %v55_v31 = vadd.f32 %v54_v27, %v53_v23 }
  0x1c   :  { %v57_v32 = vmul.f32 0.125, %v34_v28  ;;  %v58_v33 = vmul.f32 0.125, %v41_v29 }
  0x1d   :  { %v59_v34 = vmul.f32 0.125, %v48_v30  ;;  %v60_v35 = vmul.f32 0.125, %v55_v31 }
  0x1e   :  { %v66_v36 = vsel %vm65_vm1, %v58_v33, %v57_v32 }
  0x1f   :  { %v68_v37 = vsel %vm67_vm2, %v59_v34, %v66_v36 }
  0x20   :  { %v70_v38 = vsel %vm69_vm3, %v60_v35, %v68_v37 }
  0x21   :  { %73 = vst.msk [vmem:[#allocation5] sm:$0xf] %vm72_vm4, %v70_v38 }
  0x22   :  { %124 = shalt.err (!%p121_p9)
}
  0x23   :  { %83 = dma.vmem_to_hbm [thread:$0]  %s81_s13, 64, %s158_s1, [#allocation4]  }
  0x24   :  { %135 = dma.done.wait [#allocation4], 64  }
  0x25   :  { %136 = vsyncadd [#allocation4], 4294967232 }
  0x26   :  { %87 = vsyncpa [#allocation3], 1 }
  0x27   :  { %88 = vsyncpa [#allocation4], 1 }

</bundles_post_ra>
